<compile_context>
chip_gen: v7x
topology: tpu7x:2x2x1
jax: 0.10.0
libtpu: 0.0.40
codegen_flags: <defaults>
</compile_context>

<pallas_src>
import jax
import jax.numpy as jnp
from jax.experimental import pallas as pl
from jax.experimental.pallas import tpu as pltpu

HIDDEN_NEURONS = 10
_LANE = 128


def _mymodel_kernel(x_ref, w_ref, b_ref, o_ref):
    # x_ref: (F, TB)  feature-major batch tile (batch on the lane axis)
    # w_ref: (F, 1)   fused weight column  (w2 @ w1)^T
    # b_ref: (1, 1)   fused bias           w2 @ b1^T + b2
    # o_ref: (1, TB)  lane-dense probability row for this tile
    #
    # K=11, N=1 contraction -> VPU broadcast-multiply + sublane (XLU) reduce;
    # the MXU would be <1% utilized here and only adds result-FIFO latency.
    logits = jnp.sum(w_ref[...] * x_ref[...], axis=0, keepdims=True) + b_ref[...]
    o_ref[...] = jax.nn.sigmoid(logits)


def _round_up(n: int, m: int) -> int:
    return ((n + m - 1) // m) * m


def _cdiv(a: int, b: int) -> int:
    return (a + b - 1) // b


def mymodel_forward(x, params, *, block_rows=131072):
    """x: (B, F) float32. Returns (B, 1) float32 probabilities (PyTorch shape)."""
    w1, b1, w2, b2 = params
    B, F = x.shape
    H = w1.shape[0]
    assert w1.shape == (H, F) and b1.shape == (1, H)
    assert w2.shape == (1, H) and b2.shape == (1, 1)

    # Linear(F,H) -> Linear(H,1) with no nonlinearity in between collapses
    # exactly to one affine map: y = x @ w_eff + b_eff.
    w_eff = (w2 @ w1).T.astype(jnp.float32)          # (F, 1)
    b_eff = (w2 @ b1.T + b2).astype(jnp.float32)     # (1, 1)

    # ---- batch tiling ----------------------------------------------------
    # tb is a multiple of 128 so the (F, tb) x tiles and (1, tb) output tiles
    # are full-lane (unmasked loads/stores).  Choose the tile COUNT first,
    # then the smallest aligned tile size, so padding waste is tiny.
    b128 = _round_up(max(B, 1), _LANE)
    target_tb = max(_LANE, (block_rows // _LANE) * _LANE)
    num_tiles = _cdiv(b128, target_tb)
    if num_tiles == 1 and b128 >= 2 * _LANE:
        # v7x megacore: give the 'parallel' grid at least two steps so both
        # TensorCores get work (harmless on single-TC v5e/v6e).
        num_tiles = 2
    tb = _round_up(_cdiv(B, num_tiles), _LANE)
    b_pad = num_tiles * tb

    # Feature-major x: (F, b_pad) -> batch on the lane axis.  One-time
    # transpose pass over x; upstream producers can emit it transposed.
    if b_pad != B:
        x = jnp.pad(x, ((0, b_pad - B), (0, 0)))
    xt = x.T.astype(jnp.float32)                      # (F, b_pad)

    out = pl.pallas_call(
        _mymodel_kernel,
        out_shape=jax.ShapeDtypeStruct((1, b_pad), jnp.float32),
        grid=(num_tiles,),
        in_specs=[
            pl.BlockSpec((F, tb), lambda i: (0, i)),   # stream x tiles
            pl.BlockSpec((F, 1), lambda i: (0, 0)),    # fused weight, resident
            pl.BlockSpec((1, 1), lambda i: (0, 0)),    # fused bias, resident
        ],
        out_specs=pl.BlockSpec((1, tb), lambda i: (0, i)),
        compiler_params=pltpu.CompilerParams(
            dimension_semantics=("parallel",),
            # Feature-major x tile ~= 64 B/row -> ~16 MiB double-buffered at
            # the 128k-row cap plus the output buffers; 48 MiB leaves headroom
            # on every generation (v5e default scoped limit is only 16 MiB,
            # v7x physical VMEM is 64 MiB).
            vmem_limit_bytes=48 << 20),
    )(xt, w_eff, b_eff)

    # (1, b_pad) -> (B, 1), matching torch's forward output (no squeeze).
    return out[0, :B][:, None]


def init_params(key, input_size, hidden=HIDDEN_NEURONS):
    """Deterministic synthetic params in torch nn.Linear layout (out, in)."""
    k1, k2, k3, k4 = jax.random.split(key, 4)
    lim1 = float(input_size) ** -0.5
    lim2 = float(hidden) ** -0.5
    w1 = jax.random.uniform(k1, (hidden, input_size), jnp.float32, -lim1, lim1)
    b1 = jax.random.uniform(k2, (1, hidden), jnp.float32, -lim1, lim1)
    w2 = jax.random.uniform(k3, (1, hidden), jnp.float32, -lim2, lim2)
    b2 = jax.random.uniform(k4, (1, 1), jnp.float32, -lim2, lim2)
    return (w1, b1, w2, b2)


def _reference(x, params):
    # Unfused two-layer reference (verifies both the kernel and the host-side
    # weight fusion against the original module's math).
    w1, b1, w2, b2 = params
    h = x @ w1.T + b1
    return jax.nn.sigmoid(h @ w2.T + b2)


if __name__ == "__main__":
    key = jax.random.PRNGKey(0)
    k_x1, k_x2, k_p = jax.random.split(key, 3)

    input_size = 11   # riceClassification.csv feature columns (X.shape[1])
    params = init_params(k_p, input_size, HIDDEN_NEURONS)

    # Small single-tile case (exercises padding + slice-off).
    x1 = jax.random.normal(k_x1, (16, input_size), jnp.float32)
    y1 = mymodel_forward(x1, params)
    jax.block_until_ready(y1)
    assert y1.shape == (16, 1)
    assert bool(jnp.allclose(y1, _reference(x1, params), atol=5e-3, rtol=0))

    # Multi-tile case exercising the batch grid + padding (B=300, 3 tiles of 128).
    x2 = jax.random.normal(k_x2, (300, input_size), jnp.float32)
    y2 = mymodel_forward(x2, params, block_rows=128)
    jax.block_until_ready(y2)
    assert y2.shape == (300, 1)
    assert bool(jnp.allclose(y2, _reference(x2, params), atol=5e-3, rtol=0))

    # Default tiling path (exercises the >=2-tile megacore branch: 2 tiles of 256).
    y3 = mymodel_forward(x2, params)
    jax.block_until_ready(y3)
    assert y3.shape == (300, 1)
    assert bool(jnp.allclose(y3, _reference(x2, params), atol=5e-3, rtol=0))

    assert bool(jnp.all((y1 >= 0.0) & (y1 <= 1.0)))
    assert bool(jnp.all((y2 >= 0.0) & (y2 <= 1.0)))
    print("KERNEL_OK")
</pallas_src>

<mosaic_0001>
module attributes {stable_mosaic.version = 11 : i64} {
  func.func @_mymodel_kernel(%arg0: i32, %arg1: memref<11x128xf32, #tpu.memory_space<vmem>>, %arg2: memref<11x1xf32, #tpu.memory_space<vmem>>, %arg3: memref<1x1xf32, #tpu.memory_space<vmem>>, %arg4: memref<1x128xf32, #tpu.memory_space<vmem>>) attributes {dimension_semantics = [#tpu.dimension_semantics<parallel>], iteration_bounds = array<i64: 1>, scalar_prefetch = 0 : i64, scratch_operands = 0 : i64, tpu.core_type = #tpu.core_type<tc>, window_params = [{transform_indices = @transform_0, window_bounds = array<i64: 11, 128>}, {pipeline_mode = #tpu.pipeline_mode<synchronous>, transform_indices = @transform_1, window_bounds = array<i64: 11, 1>}, {pipeline_mode = #tpu.pipeline_mode<synchronous>, transform_indices = @transform_2, window_bounds = array<i64: 1, 1>}, {transform_indices = @transform_3, window_bounds = array<i64: 1, 128>}]} {
    %c0 = arith.constant 0 : index
    %c0_0 = arith.constant 0 : index
    %0 = vector.load %arg2[%c0, %c0_0] : memref<11x1xf32, #tpu.memory_space<vmem>>, vector<11x1xf32>
    %c0_1 = arith.constant 0 : index
    %c0_2 = arith.constant 0 : index
    %1 = vector.load %arg1[%c0_1, %c0_2] : memref<11x128xf32, #tpu.memory_space<vmem>>, vector<11x128xf32>
    %2 = vector.broadcast %0 : vector<11x1xf32> to vector<11x128xf32>
    %3 = arith.mulf %2, %1 : vector<11x128xf32>
    %cst = arith.constant dense<0.000000e+00> : vector<128xf32>
    %4 = vector.multi_reduction <add>, %3, %cst [0] : vector<11x128xf32> to vector<128xf32>
    %5 = vector.shape_cast %4 : vector<128xf32> to vector<1x128xf32>
    %c0_3 = arith.constant 0 : index
    %c0_4 = arith.constant 0 : index
    %6 = vector.load %arg3[%c0_3, %c0_4] : memref<1x1xf32, #tpu.memory_space<vmem>>, vector<1x1xf32>
    %7 = vector.broadcast %6 : vector<1x1xf32> to vector<1x128xf32>
    %8 = arith.addf %5, %7 : vector<1x128xf32>
    %9 = arith.negf %8 : vector<1x128xf32>
    %10 = math.exp %9 : vector<1x128xf32>
    %cst_5 = arith.constant 1.000000e+00 : f32
    %11 = vector.broadcast %cst_5 : f32 to vector<1x128xf32>
    %12 = arith.addf %11, %10 : vector<1x128xf32>
    %13 = arith.divf %11, %12 : vector<1x128xf32>
    %c0_6 = arith.constant 0 : index
    %c0_7 = arith.constant 0 : index
    %14 = vector.load %arg4[%c0_6, %c0_7] : memref<1x128xf32, #tpu.memory_space<vmem>>, vector<1x128xf32>
    tpu.vector_store %arg4[%c0_6, %c0_7], %13 {strides = array<i32>} : memref<1x128xf32, #tpu.memory_space<vmem>>, vector<1x128xf32>,
    return
  }
  func.func @transform_0(%arg0: i32) -> (i32, i32) {
    %c0_i32 = arith.constant 0 : i32
    %c0_i32_0 = arith.constant 0 : i32
    return %c0_i32, %arg0 : i32, i32
  }
  func.func @transform_1(%arg0: i32) -> (i32, i32) {
    %c0_i32 = arith.constant 0 : i32
    %c0_i32_0 = arith.constant 0 : i32
    %c0_i32_1 = arith.constant 0 : i32
    return %c0_i32, %c0_i32_0 : i32, i32
  }
  func.func @transform_2(%arg0: i32) -> (i32, i32) {
    %c0_i32 = arith.constant 0 : i32
    %c0_i32_0 = arith.constant 0 : i32
    %c0_i32_1 = arith.constant 0 : i32
    return %c0_i32, %c0_i32_0 : i32, i32
  }
  func.func @transform_3(%arg0: i32) -> (i32, i32) {
    %c0_i32 = arith.constant 0 : i32
    %c0_i32_0 = arith.constant 0 : i32
    return %c0_i32, %arg0 : i32, i32
  }
}

</mosaic_0001>

<bundles_post_ra>
// kernel: tpu_custom_call.1
= control target key start
LH: loop header
LB: loop body
LE: loop exit
PB: predicated region body
PF: predicated region fallthrough
CT: control target
= control target key end

     0   :  { %s156_s0 = inlined_call_operand.vmem [shape: f32[11,128], index: 0, kind: input, shape index: {}]   ;;  %s157_s1 = inlined_call_operand.vmem [shape: f32[11,1], index: 1, kind: input, shape index: {}]   ;;  %s158_s2 = inlined_call_operand.<no memory space> [shape: f32[1,1], index: 2, kind: input, shape index: {}]   ;;  %s159_s3 = inlined_call_operand.hbm [shape: f32[1,128], index: 3, kind: output, shape index: {}]  }
   0x1   :  { %v8_v0 = vstv %s158_s2 }
   0x2   :  { %9 = vst [vmem:[#allocation2] sm:$0x1] %v8_v0 }
   0x3   :  { %v18_v1 = vld [vmem:[%s157_s1 + $0x8] sm:$0x7]  ;;  %v107_v3 = vmov 0  }
   0x4   :  { %77 = vset.pattern.permute.xlu0 %v107_v3  ;;  %78 = vset.pattern.permute.xlu1 %v107_v3 }
   0x9   :  { %v42_v2 = vld [vmem:[#allocation2] sm:$0x1] }
   0xa   :  { %10 = vsyncpa [#allocation4], 0  ;;  %28 = vperm.xlu0 %77, %v18_v1   ;;  %45 = vperm.xlu1 %78, %v42_v2   ;;  %v17_v4 = vld [vmem:[%s157_s1] sm:$0xff]  ;;  %v20_v5 = vld [vmem:[%s156_s0 + $0x8] sm:$0x7]  ;;  %vm33_vm0 = vcmask 1042432   ;;  %v48_v11 = vlaneseq }
   0xb   :  { %v19_v8 = vld [vmem:[%s156_s0] sm:$0xff]  ;;  %s108_s0 = smov [#allocation3]  }
   0xc   :  { %v49_v15 = vshrl.u32 %v48_v11, 7  ;;  %s66_s1 = sshll.u32 %s108_s0, 4  ;;  %s67_s1 = int_to_ptr.vmem [resolvable:$true] %s66_s1 }
   0xd   :  { %s83_s21 = scalar_lea.vmem %s67_s1, 16  ;;  %s87_s22 = scalar_lea.vmem %s67_s1, 32 }
   0xe   :  { %23 = vperm.xlu0 %77, %v17_v4   ;;  %v50_v18 = vsub.s32 0, %v49_v15  ;;  %p84_p0 = scmp.ne.s32.totalorder %s67_s1, %s83_s21  ;;  %p88_p1 = scmp.lt.s32.totalorder %s67_s1, %s67_s1 }
   0xf   :  { %p89_p2 = scmp.lt.s32.totalorder %s87_s22, %s83_s21 }
  0x11   :  { %p90_p3 = por %p89_p2, %p88_p1 }
  0x13   :  { %p91_p4 = pnand %p90_p3, %p84_p0 }
  0x89   :  { %v29_v6 = vpop.permute.xlu0 %28  ;;  %v46_v19 = vpop.permute.xlu1 %45 }
  0x8a   :  { %v32_v7 = vmul.f32 %v29_v6, %v20_v5  ;;  %v51_v22 = vrot.slane %v46_v19, %v50_v18 }
  0x8c   :  { %v34_v12 = vsel %vm33_vm0, %v32_v7, 0.0 }
  0x8d   :  { %v24_v9 = vpop.permute.xlu0 %23 }
  0x8e   :  { %v31_v10 = vmul.f32 %v24_v9, %v19_v8 }
  0x90   :  { %v35_v13 = vadd.f32 %v34_v12, %v31_v10 }
  0x92   :  { %v36_v14 = vrot.slane %v35_v13, 4 }
  0x94   :  { %v37_v16 = vadd.f32 %v36_v14, %v35_v13 }
  0x96   :  { %v38_v17 = vrot.slane %v37_v16, 2 }
  0x98   :  { %v39_v20 = vadd.f32 %v38_v17, %v37_v16 }
  0x9a   :  { %v40_v21 = vrot.slane %v39_v20, 1 }
  0x9c   :  { %v41_v23 = vadd.f32 %v40_v21, %v39_v20 }
  0x9e   :  { %v52_v24 = vadd.f32 %v51_v22, %v41_v23 }
  0xa0   :  { %v74_v25 = vmul.f32 -1.442695, %v52_v24 }
  0xa2   :  { %79 = vpow2.f32 %v74_v25 }
  0xac   :  { %v80_v26 = vpop.eup %79 }
  0xad   :  { %v56_v27 = vadd.f32 1.0, %v80_v26 }
  0xaf   :  { %81 = vrcp.f32 %v56_v27 }
  0xb9   :  { %v82_v28 = vpop.eup %81 }
  0xba   :  { %59 = vst [vmem:[#allocation3] sm:$0x1] %v82_v28 }
  0xbb   :  { %94 = shalt.err (!%p91_p4)
}
  0xbc   :  { %s95_s25 = scalar_lea.hbm %s159_s3, 16 }
  0xbd   :  { %p96_p5 = scmp.ne.s32.totalorder %s159_s3, %s95_s25  ;;  %p99_p6 = scmp.lt.u32.totalorder %s95_s25, %s159_s3 }
  0xbf   :  { %p101_p7 = pnand %p99_p6, %p96_p5 }
  0xc1   :  { %104 = shalt.err (!%p101_p7)
}
  0xc2   :  { %69 = dma.vmem_to_hbm [thread:$0]  %s67_s1, 16, %s159_s3, [#allocation4]  }
  0xc3   :  { %105 = dma.done.wait [#allocation4], 16  }
  0xc4   :  { %106 = vsyncadd [#allocation4], 4294967280 }
  0xc5   :  { %73 = vsyncpa [#allocation4], 1 }

</bundles_post_ra>
